<compile_context>
chip_gen: v7x
topology: tpu7x:2x2x1
jax: 0.10.0
libtpu: 0.0.40
codegen_flags: <defaults>
</compile_context>

<pallas_src>
import jax
import jax.numpy as jnp
import numpy as np
from jax.experimental import pallas as pl
from jax.experimental.pallas import tpu as pltpu

BN_EPS = 1e-5
L2_EPS = 1e-12


def _round_up(x, m):
    return ((x + m - 1) // m) * m


def _vmem_info():
    """(physical VMEM bytes, tile-selection budget) for this TPU generation."""
    cap = 64 * 1024 * 1024            # conservative default (v7x-sized)
    try:
        cap = int(pltpu.get_tpu_info().vmem_capacity_bytes)
    except Exception:                 # interpret mode / query unavailable
        pass
    # ~3/8 of physical: ~48 MiB on v5e/v6e (128 MiB), ~24 MiB on v7x (64 MiB).
    return cap, (cap * 3) // 8


def _footprint_bytes(pt, tk, n, c_pad, x_bytes, w_bytes, f_bytes, l_bytes):
    """Double-buffered block footprint + scratch + in-kernel f32 temporaries."""
    blk_in = (pt * n * c_pad * x_bytes        # x tile
              + 2 * pt * c_pad * 4            # gamma + beta tiles (f32)
              + pt * c_pad * tk * w_bytes     # classifier weight tile
              + pt * tk * 4)                  # precomputed inverse column norms
    blk_out = pt * n * c_pad * f_bytes + pt * n * tk * l_bytes
    scratch = pt * n * c_pad * 4              # resident f32 normalized feature
    temps = 4 * pt * n * c_pad * 4 + pt * n * tk * 4   # x_f32 / y / f_n / logits
    return 2 * (blk_in + blk_out) + scratch + temps


def _choose_tiles(p, n, c_pad, k_pad, x_bytes, w_bytes, f_bytes, l_bytes,
                  budget):
    def fits(pt, tk):
        return _footprint_bytes(pt, tk, n, c_pad, x_bytes, w_bytes,
                                f_bytes, l_bytes) <= budget

    # Largest class tile (multiple of 128 dividing k_pad) that fits with pt=1.
    tk = 128
    cand = k_pad
    while cand >= 128:
        if k_pad % cand == 0 and fits(1, cand):
            tk = cand
            break
        cand -= 128

    # Largest part tile (divisor of p) that fits, while keeping >=2 part steps
    # when p >= 2 (pipelined weight streaming; megacore sharding on v7x).
    pt_cap = p if p < 2 else max(1, p // 2)
    pt = 1
    for cand in range(pt_cap, 0, -1):
        if p % cand == 0 and fits(cand, tk):
            pt = cand
            break
    return pt, tk


def _bnneck_kernel(x_ref, gamma_ref, beta_ref, w_ref, invw_ref,
                   feat_ref, logit_ref, fnorm_ref):
    # Grid: (part tiles, class tiles). BN + feature normalization depend only
    # on the part tile, so compute them once per part tile (k == 0), cache the
    # normalized feature in VMEM scratch, and reuse it for every class tile.
    @pl.when(pl.program_id(1) == 0)
    def _():
        x = x_ref[...].astype(jnp.float32)                      # (pt, n, c)
        gamma = gamma_ref[...].astype(jnp.float32)              # (pt, 1, c)
        beta = beta_ref[...].astype(jnp.float32)                # (pt, 1, c)

        # BatchNorm1d (training-mode batch stats, biased variance), applied as
        # a fused per-channel scale/shift.
        mean = jnp.mean(x, axis=1, keepdims=True)               # (pt, 1, c)
        var = jnp.mean(jnp.square(x - mean), axis=1, keepdims=True)
        scale = gamma * jax.lax.rsqrt(var + BN_EPS)
        shift = beta - mean * scale
        y = x * scale + shift                                   # (pt, n, c)

        # F.normalize(y, dim=-1): y / max(||y||, 1e-12).
        # max(sqrt(ss), eps) == sqrt(max(ss, eps^2)) -> single rsqrt (EUP).
        ss = jnp.sum(y * y, axis=2, keepdims=True)              # (pt, n, 1)
        f_n = y * jax.lax.rsqrt(jnp.maximum(ss, L2_EPS * L2_EPS))
        fnorm_ref[...] = f_n
        feat_ref[...] = f_n.astype(feat_ref.dtype)

    # Classifier: logits = f_n @ normalize(w, dim=c) == (f_n @ w) * inv_w,
    # with inv_w precomputed outside the kernel. Weights stay in their native
    # dtype; accumulate in f32 on the MXU.
    w = w_ref[...]                                              # (pt, c, tk)
    f_n = fnorm_ref[...].astype(w.dtype)
    logits = jnp.einsum("pnc,pck->pnk", f_n, w,
                        preferred_element_type=jnp.float32)     # (pt, n, tk)
    logit_ref[...] = (logits * invw_ref[...]).astype(logit_ref.dtype)


def precompute_fc_inv_norm(fc_bin):
    """rsqrt of the per-column squared L2 norm of fc_bin (dim=1), shape (p,1,K).

    Pure function of the parameters — compute once at setup time and reuse.
    """
    wss = jnp.sum(jnp.square(fc_bin.astype(jnp.float32)), axis=1,
                  keepdims=True)                                 # (p, 1, K)
    return jax.lax.rsqrt(jnp.maximum(wss, L2_EPS * L2_EPS))


def separate_bn_necks(x, bn_gamma, bn_beta, fc_bin, fc_inv_norm=None):
    """x: [n, c, p]; bn_gamma/bn_beta: [c*p]; fc_bin: [p, c, class_num].

    Returns (feature [n, c, p], logits [n, class_num, p]) matching the PyTorch
    module with norm=True (feature is the L2-normalized, BN'd feature).
    """
    n, c, p = x.shape
    class_num = fc_bin.shape[-1]
    c_pad = _round_up(c, 128)
    k_pad = _round_up(class_num, 128)

    if fc_inv_norm is None:
        fc_inv_norm = precompute_fc_inv_norm(fc_bin)

    # Kernel layout: part-major [p, n, c] (n on sublanes, c lane-dense).
    x_pnc = jnp.transpose(x, (2, 0, 1))
    # Flattened BN parameters are indexed feature = ci * p + pi.
    gamma_p = jnp.transpose(bn_gamma.astype(jnp.float32).reshape(c, p),
                            (1, 0))[:, None, :]                  # (p, 1, c)
    beta_p = jnp.transpose(bn_beta.astype(jnp.float32).reshape(c, p),
                           (1, 0))[:, None, :]
    w = fc_bin                                                   # (p, c, K)
    inv_w = fc_inv_norm.astype(jnp.float32)                      # (p, 1, K)

    # Zero-pad lane dims to multiples of 128 (unmasked full-vreg loads/stores).
    # Padded channels stay exactly 0 through BN / normalize / matmul; padded
    # class columns get inv_w == 0 so their logits are exactly 0. Both padded
    # regions are sliced off below.
    if c_pad != c:
        x_pnc = jnp.pad(x_pnc, ((0, 0), (0, 0), (0, c_pad - c)))
        gamma_p = jnp.pad(gamma_p, ((0, 0), (0, 0), (0, c_pad - c)))
        beta_p = jnp.pad(beta_p, ((0, 0), (0, 0), (0, c_pad - c)))
        w = jnp.pad(w, ((0, 0), (0, c_pad - c), (0, 0)))
    if k_pad != class_num:
        w = jnp.pad(w, ((0, 0), (0, 0), (0, k_pad - class_num)))
        inv_w = jnp.pad(inv_w, ((0, 0), (0, 0), (0, k_pad - class_num)))

    feat_dtype = x.dtype
    logit_dtype = jnp.result_type(x.dtype, fc_bin.dtype)
    x_bytes = jnp.dtype(x.dtype).itemsize
    w_bytes = jnp.dtype(fc_bin.dtype).itemsize
    f_bytes = jnp.dtype(feat_dtype).itemsize
    l_bytes = jnp.dtype(logit_dtype).itemsize

    cap, budget = _vmem_info()
    pt, tk = _choose_tiles(p, n, c_pad, k_pad, x_bytes, w_bytes, f_bytes,
                           l_bytes, budget)
    needed = _footprint_bytes(pt, tk, n, c_pad, x_bytes, w_bytes, f_bytes,
                              l_bytes)
    vmem_limit = int(min(max(cap - (4 << 20), 1 << 20),
                         max(budget, needed + (2 << 20))))
    grid = (p // pt, k_pad // tk)

    cost = pl.CostEstimate(
        flops=int(2 * p * n * c_pad * k_pad + 10 * p * n * c_pad),
        transcendentals=int(p * n + p * c_pad),
        bytes_accessed=int(p * n * c_pad * (x_bytes + f_bytes)
                           + p * c_pad * k_pad * w_bytes
                           + p * n * k_pad * l_bytes),
    )

    feat_pnc, logit_pnk = pl.pallas_call(
        _bnneck_kernel,
        out_shape=(
            jax.ShapeDtypeStruct((p, n, c_pad), feat_dtype),
            jax.ShapeDtypeStruct((p, n, k_pad), logit_dtype),
        ),
        grid_spec=pltpu.PrefetchScalarGridSpec(
            num_scalar_prefetch=0,
            grid=grid,
            in_specs=[
                pl.BlockSpec((pt, n, c_pad), lambda i, k: (i, 0, 0)),
                pl.BlockSpec((pt, 1, c_pad), lambda i, k: (i, 0, 0)),
                pl.BlockSpec((pt, 1, c_pad), lambda i, k: (i, 0, 0)),
                pl.BlockSpec((pt, c_pad, tk), lambda i, k: (i, 0, k)),
                pl.BlockSpec((pt, 1, tk), lambda i, k: (i, 0, k)),
            ],
            out_specs=[
                pl.BlockSpec((pt, n, c_pad), lambda i, k: (i, 0, 0)),
                pl.BlockSpec((pt, n, tk), lambda i, k: (i, 0, k)),
            ],
            scratch_shapes=[pltpu.VMEM((pt, n, c_pad), jnp.float32)],
        ),
        compiler_params=pltpu.CompilerParams(
            dimension_semantics=("parallel", "arbitrary"),
            vmem_limit_bytes=vmem_limit,
        ),
        cost_estimate=cost,
    )(x_pnc, gamma_p, beta_p, w, inv_w)

    if c_pad != c:
        feat_pnc = feat_pnc[:, :, :c]
    if k_pad != class_num:
        logit_pnk = logit_pnk[:, :, :class_num]

    # Back to the PyTorch return layouts.
    feature = jnp.transpose(feat_pnc, (1, 2, 0))    # [n, c, p]
    logits = jnp.transpose(logit_pnk, (1, 2, 0))    # [n, class_num, p]
    return feature, logits


def _reference(x, bn_gamma, bn_beta, fc_bin):
    """Pure-JAX port of the PyTorch forward (norm=True, parallel_BN1d=True)."""
    n, c, p = x.shape
    xf = x.reshape(n, c * p)
    mean = jnp.mean(xf, axis=0, keepdims=True)
    var = jnp.mean((xf - mean) ** 2, axis=0, keepdims=True)
    xf = (xf - mean) / jnp.sqrt(var + BN_EPS) * bn_gamma + bn_beta
    xb = xf.reshape(n, c, p)
    feature = jnp.transpose(xb, (2, 0, 1))                          # [p, n, c]
    f_n = feature / jnp.maximum(
        jnp.linalg.norm(feature, axis=-1, keepdims=True), L2_EPS)
    w_n = fc_bin / jnp.maximum(
        jnp.linalg.norm(fc_bin, axis=1, keepdims=True), L2_EPS)
    logits = jnp.einsum("pnc,pck->pnk", f_n, w_n)
    # Module returns the NORMALIZED feature when norm=True.
    return jnp.transpose(f_n, (1, 2, 0)), jnp.transpose(logits, (1, 2, 0))


if __name__ == "__main__":
    # Small shapes consistent with the module: n=batch, c=in_channels,
    # p=parts_num, class_num.
    n, c, p, class_num = 8, 32, 4, 16

    key = jax.random.PRNGKey(0)
    kx, kw, kg, kb = jax.random.split(key, 4)

    x = jax.random.normal(kx, (n, c, p), dtype=jnp.float32)

    # fc_bin: xavier_uniform on zeros(p, c, class_num)
    fan_in = c * class_num
    fan_out = p * class_num
    bound = float(np.sqrt(6.0 / (fan_in + fan_out)))
    fc_bin = jax.random.uniform(kw, (p, c, class_num), dtype=jnp.float32,
                                minval=-bound, maxval=bound)
    # BatchNorm1d(c*p) affine params (perturbed from init to exercise the
    # scale/shift path).
    bn_gamma = 1.0 + 0.1 * jax.random.normal(kg, (c * p,), dtype=jnp.float32)
    bn_beta = 0.1 * jax.random.normal(kb, (c * p,), dtype=jnp.float32)

    feature, logits = separate_bn_necks(x, bn_gamma, bn_beta, fc_bin)
    jax.block_until_ready((feature, logits))

    feat_ref, logit_ref = _reference(x, bn_gamma, bn_beta, fc_bin)
    assert feature.shape == (n, c, p) and logits.shape == (n, class_num, p)
    np.testing.assert_allclose(np.asarray(feature), np.asarray(feat_ref),
                               rtol=1e-4, atol=1e-5)
    np.testing.assert_allclose(np.asarray(logits), np.asarray(logit_ref),
                               rtol=1e-4, atol=1e-5)
    print("KERNEL_OK")
</pallas_src>

<mosaic_0001>
module attributes {stable_mosaic.version = 11 : i64} {
  func.func @_bnneck_kernel(%arg0: i32, %arg1: i32, %arg2: memref<2x8x128xf32, #tpu.memory_space<vmem>>, %arg3: memref<2x1x128xf32, #tpu.memory_space<vmem>>, %arg4: memref<2x1x128xf32, #tpu.memory_space<vmem>>, %arg5: memref<2x128x128xf32, #tpu.memory_space<vmem>>, %arg6: memref<2x1x128xf32, #tpu.memory_space<vmem>>, %arg7: memref<2x8x128xf32, #tpu.memory_space<vmem>>, %arg8: memref<2x8x128xf32, #tpu.memory_space<vmem>>, %arg9: memref<2x8x128xf32, #tpu.memory_space<vmem>>) attributes {dimension_semantics = [#tpu.dimension_semantics<parallel>, #tpu.dimension_semantics<arbitrary>], iteration_bounds = array<i64: 2, 1>, scalar_prefetch = 0 : i64, scratch_operands = 1 : i64, tpu.core_type = #tpu.core_type<tc>, window_params = [{transform_indices = @transform_0, window_bounds = array<i64: 2, 8, 128>}, {transform_indices = @transform_1, window_bounds = array<i64: 2, 1, 128>}, {transform_indices = @transform_2, window_bounds = array<i64: 2, 1, 128>}, {transform_indices = @transform_3, window_bounds = array<i64: 2, 128, 128>}, {transform_indices = @transform_4, window_bounds = array<i64: 2, 1, 128>}, {transform_indices = @transform_5, window_bounds = array<i64: 2, 8, 128>}, {transform_indices = @transform_6, window_bounds = array<i64: 2, 8, 128>}]} {
    %c0_i32 = arith.constant 0 : i32
    %0 = arith.cmpi eq, %arg1, %c0_i32 : i32
    %1 = arith.extui %0 : i1 to i32
    %c0_i32_0 = arith.constant 0 : i32
    %2 = arith.cmpi ne, %1, %c0_i32_0 : i32
    scf.if %2 {
      %c0_12 = arith.constant 0 : index
      %c0_13 = arith.constant 0 : index
      %c0_14 = arith.constant 0 : index
      %10 = vector.load %arg2[%c0_12, %c0_13, %c0_14] : memref<2x8x128xf32, #tpu.memory_space<vmem>>, vector<2x8x128xf32>
      %c0_15 = arith.constant 0 : index
      %c0_16 = arith.constant 0 : index
      %c0_17 = arith.constant 0 : index
      %11 = vector.load %arg3[%c0_15, %c0_16, %c0_17] : memref<2x1x128xf32, #tpu.memory_space<vmem>>, vector<2x1x128xf32>
      %c0_18 = arith.constant 0 : index
      %c0_19 = arith.constant 0 : index
      %c0_20 = arith.constant 0 : index
      %12 = vector.load %arg4[%c0_18, %c0_19, %c0_20] : memref<2x1x128xf32, #tpu.memory_space<vmem>>, vector<2x1x128xf32>
      %cst_21 = arith.constant dense<0.000000e+00> : vector<2x128xf32>
      %13 = vector.multi_reduction <add>, %10, %cst_21 [1] : vector<2x8x128xf32> to vector<2x128xf32>
      %14 = vector.shape_cast %13 : vector<2x128xf32> to vector<2x1x128xf32>
      %cst_22 = arith.constant 8.000000e+00 : f32
      %15 = vector.broadcast %cst_22 : f32 to vector<2x1x128xf32>
      %16 = arith.divf %14, %15 : vector<2x1x128xf32>
      %17 = vector.broadcast %16 : vector<2x1x128xf32> to vector<2x8x128xf32>
      %18 = arith.subf %10, %17 : vector<2x8x128xf32>
      %19 = arith.mulf %18, %18 : vector<2x8x128xf32>
      %cst_23 = arith.constant dense<0.000000e+00> : vector<2x128xf32>
      %20 = vector.multi_reduction <add>, %19, %cst_23 [1] : vector<2x8x128xf32> to vector<2x128xf32>
      %21 = vector.shape_cast %20 : vector<2x128xf32> to vector<2x1x128xf32>
      %cst_24 = arith.constant 8.000000e+00 : f32
      %22 = vector.broadcast %cst_24 : f32 to vector<2x1x128xf32>
      %23 = arith.divf %21, %22 : vector<2x1x128xf32>
      %cst_25 = arith.constant 9.99999974E-6 : f32
      %24 = vector.broadcast %cst_25 : f32 to vector<2x1x128xf32>
      %25 = arith.addf %23, %24 : vector<2x1x128xf32>
      %26 = math.rsqrt %25 : vector<2x1x128xf32>
      %27 = arith.mulf %11, %26 : vector<2x1x128xf32>
      %28 = arith.mulf %16, %27 : vector<2x1x128xf32>
      %29 = arith.subf %12, %28 : vector<2x1x128xf32>
      %30 = vector.broadcast %27 : vector<2x1x128xf32> to vector<2x8x128xf32>
      %31 = arith.mulf %10, %30 : vector<2x8x128xf32>
      %32 = vector.broadcast %29 : vector<2x1x128xf32> to vector<2x8x128xf32>
      %33 = arith.addf %31, %32 : vector<2x8x128xf32>
      %34 = arith.mulf %33, %33 : vector<2x8x128xf32>
      %cst_26 = arith.constant dense<0.000000e+00> : vector<2x8xf32>
      %35 = vector.multi_reduction <add>, %34, %cst_26 [2] : vector<2x8x128xf32> to vector<2x8xf32>
      %36 = vector.shape_cast %35 : vector<2x8xf32> to vector<2x8x1xf32>
      %cst_27 = arith.constant 1.000000e-24 : f32
      %37 = vector.broadcast %cst_27 : f32 to vector<2x8x1xf32>
      %38 = arith.maximumf %36, %37 : vector<2x8x1xf32>
      %39 = math.rsqrt %38 : vector<2x8x1xf32>
      %40 = vector.broadcast %39 : vector<2x8x1xf32> to vector<2x8x128xf32>
      %41 = arith.mulf %33, %40 : vector<2x8x128xf32>
      %c0_28 = arith.constant 0 : index
      %c0_29 = arith.constant 0 : index
      %c0_30 = arith.constant 0 : index
      %42 = vector.load %arg9[%c0_28, %c0_29, %c0_30] : memref<2x8x128xf32, #tpu.memory_space<vmem>>, vector<2x8x128xf32>
      tpu.vector_store %arg9[%c0_28, %c0_29, %c0_30], %41 {strides = array<i32>} : memref<2x8x128xf32, #tpu.memory_space<vmem>>, vector<2x8x128xf32>,
      %c0_31 = arith.constant 0 : index
      %c0_32 = arith.constant 0 : index
      %c0_33 = arith.constant 0 : index
      %43 = vector.load %arg7[%c0_31, %c0_32, %c0_33] : memref<2x8x128xf32, #tpu.memory_space<vmem>>, vector<2x8x128xf32>
      tpu.vector_store %arg7[%c0_31, %c0_32, %c0_33], %41 {strides = array<i32>} : memref<2x8x128xf32, #tpu.memory_space<vmem>>, vector<2x8x128xf32>,
    } else {
    }
    %c0 = arith.constant 0 : index
    %c0_1 = arith.constant 0 : index
    %c0_2 = arith.constant 0 : index
    %3 = vector.load %arg5[%c0, %c0_1, %c0_2] : memref<2x128x128xf32, #tpu.memory_space<vmem>>, vector<2x128x128xf32>
    %c0_3 = arith.constant 0 : index
    %c0_4 = arith.constant 0 : index
    %c0_5 = arith.constant 0 : index
    %4 = vector.load %arg9[%c0_3, %c0_4, %c0_5] : memref<2x8x128xf32, #tpu.memory_space<vmem>>, vector<2x8x128xf32>
    "tpu.trace_start"() <{level = 10 : i32, message = "pnc,pck->pnk"}> : () -> ()
    %cst = arith.constant dense<0.000000e+00> : vector<2x8x128xf32>
    %5 = tpu.matmul %4, %3, %cst {dimension_numbers = #tpu.dot_dimension_numbers<[2], [1], [1], [2], [0, 0, 0, 1, 1, 2], [0], [0]>} : vector<2x8x128xf32>, vector<2x128x128xf32>, vector<2x8x128xf32> -> vector<2x8x128xf32>
    "tpu.trace_stop"() : () -> ()
    %c0_6 = arith.constant 0 : index
    %c0_7 = arith.constant 0 : index
    %c0_8 = arith.constant 0 : index
    %6 = vector.load %arg6[%c0_6, %c0_7, %c0_8] : memref<2x1x128xf32, #tpu.memory_space<vmem>>, vector<2x1x128xf32>
    %7 = vector.broadcast %6 : vector<2x1x128xf32> to vector<2x8x128xf32>
    %8 = arith.mulf %5, %7 : vector<2x8x128xf32>
    %c0_9 = arith.constant 0 : index
    %c0_10 = arith.constant 0 : index
    %c0_11 = arith.constant 0 : index
    %9 = vector.load %arg8[%c0_9, %c0_10, %c0_11] : memref<2x8x128xf32, #tpu.memory_space<vmem>>, vector<2x8x128xf32>
    tpu.vector_store %arg8[%c0_9, %c0_10, %c0_11], %8 {strides = array<i32>} : memref<2x8x128xf32, #tpu.memory_space<vmem>>, vector<2x8x128xf32>,
    return
  }
  func.func @transform_0(%arg0: i32, %arg1: i32) -> (i32, i32, i32) {
    %c0_i32 = arith.constant 0 : i32
    %c0_i32_0 = arith.constant 0 : i32
    %c0_i32_1 = arith.constant 0 : i32
    return %arg0, %c0_i32, %c0_i32_0 : i32, i32, i32
  }
  func.func @transform_1(%arg0: i32, %arg1: i32) -> (i32, i32, i32) {
    %c0_i32 = arith.constant 0 : i32
    %c0_i32_0 = arith.constant 0 : i32
    %c0_i32_1 = arith.constant 0 : i32
    return %arg0, %c0_i32, %c0_i32_0 : i32, i32, i32
  }
  func.func @transform_2(%arg0: i32, %arg1: i32) -> (i32, i32, i32) {
    %c0_i32 = arith.constant 0 : i32
    %c0_i32_0 = arith.constant 0 : i32
    %c0_i32_1 = arith.constant 0 : i32
    return %arg0, %c0_i32, %c0_i32_0 : i32, i32, i32
  }
  func.func @transform_3(%arg0: i32, %arg1: i32) -> (i32, i32, i32) {
    %c0_i32 = arith.constant 0 : i32
    %c0_i32_0 = arith.constant 0 : i32
    return %arg0, %c0_i32, %arg1 : i32, i32, i32
  }
  func.func @transform_4(%arg0: i32, %arg1: i32) -> (i32, i32, i32) {
    %c0_i32 = arith.constant 0 : i32
    %c0_i32_0 = arith.constant 0 : i32
    return %arg0, %c0_i32, %arg1 : i32, i32, i32
  }
  func.func @transform_5(%arg0: i32, %arg1: i32) -> (i32, i32, i32) {
    %c0_i32 = arith.constant 0 : i32
    %c0_i32_0 = arith.constant 0 : i32
    %c0_i32_1 = arith.constant 0 : i32
    return %arg0, %c0_i32, %c0_i32_0 : i32, i32, i32
  }
  func.func @transform_6(%arg0: i32, %arg1: i32) -> (i32, i32, i32) {
    %c0_i32 = arith.constant 0 : i32
    %c0_i32_0 = arith.constant 0 : i32
    return %arg0, %c0_i32, %arg1 : i32, i32, i32
  }
}

</mosaic_0001>

<bundles_post_ra>
// kernel: tpu_custom_call.1
= control target key start
LH: loop header
LB: loop body
LE: loop exit
PB: predicated region body
PF: predicated region fallthrough
CT: control target
= control target key end

     0   :  { %s1873_s0 = inlined_call_operand.hbm [shape: f32[4,8,128], index: 0, kind: input, shape index: {}]   ;;  %s1874_s1 = inlined_call_operand.hbm [shape: f32[4,1,128], index: 1, kind: input, shape index: {}]   ;;  %s1875_s2 = inlined_call_operand.vmem [shape: f32[4,1,128], index: 2, kind: input, shape index: {}]   ;;  %s1876_s3 = inlined_call_operand.hbm [shape: f32[4,128,128], index: 3, kind: input, shape index: {}]   ;;  %s1877_s4 = inlined_call_operand.vmem [shape: f32[4,1,128], index: 4, kind: input, shape index: {}]   ;;  %s1878_s5 = inlined_call_operand.hbm [shape: f32[4,8,128], index: 5, kind: output, shape index: {0}]   ;;  %s1879_s6 = inlined_call_operand.hbm [shape: f32[4,8,128], index: 6, kind: output, shape index: {1}]  }
   0x1   :  { %1886 = sst [smem:[#allocation20_spill]] %s1873_s0 }
   0x2   :  { %1887 = sst [smem:[#allocation21_spill]] %s1874_s1 }
   0x3   :  { %12 = vsyncpa [#allocation4], 0 }
   0x4   :  { %14 = vsyncpa [#allocation4 + $0x1], 0 }
   0x5   :  { %15 = vsyncpa [#allocation7], 0 }
   0x6   :  { %17 = vsyncpa [#allocation7 + $0x1], 0 }
   0x7   :  { %18 = vsyncpa [#allocation5], 0 }
   0x8   :  { %20 = vsyncpa [#allocation5 + $0x1], 0 }
   0x9   :  { %21 = vsyncpa [#allocation11], 0 }
   0xa   :  { %23 = vsyncpa [#allocation11 + $0x1], 0  ;;  %s1479_s21 = smov 0   ;;  %s1481_s22 = smov 0  }
   0xb   :  { %s1483_s23 = smov 0   ;;  %s1485_s24 = smov 0  }
   0xc   :  { %s1487_s25 = smov 0   ;;  %s1489_s26 = smov 0  }
   0xd LB: > { %1888 = sst [smem:[#allocation16_spill]] %s1416_s23  ;;  %s1510_s27 = sadd.s32 4294967295, %s1428_s26   ;;  %s1428_s26 = sphi %s1489_s26, %s29_s26   ;;  %s1424_s25 = sphi %s1487_s25, %s1913_s25   ;;  %s1420_s24 = sphi %s1485_s24, %s1912_s24   ;;  %s1416_s23 = sphi %s1483_s23, %s1908_s23   ;;  %s1412_s22 = sphi %s1481_s22, %s1911_s22   ;;  %s1408_s21 = sphi %s1479_s21, %s1910_s21  }
   0xe   : > { %1889 = sst [smem:[#allocation17_spill]] %s1428_s26  ;;  %s937_s28 = sadd.s32 4294967294, %s1428_s26  }
   0xf   : > { %s41_s29 = sadd.s32 1, %s1424_s25  ;;  %s48_s30 = sadd.s32 1, %s1416_s23 }
  0x10   : > { %p43_p0 = scmp.ge.s32.totalorder %s41_s29, 2  ;;  %p55_p1 = scmp.ne.s32.totalorder %s1416_s23, %s1412_s22 }
  0x11   : > { %p56_p2 = scmp.eq.s32.totalorder %s1428_s26, 0  ;;  %p61_p3 = scmp.ne.s32.totalorder %s1412_s22, %s1408_s21 }
  0x12   : > { %s1915_s29 = smov (%p43_p0, %s41_s29), 0  ;;  %p62_p5 = scmp.eq.s32.totalorder %s1510_s27, 0 }
  0x13   : > { %1890 = sst [smem:[#allocation18_spill]] %s1915_s29  ;;  %p1522_p4 = por %p56_p2, %p55_p1 }
  0x14   : > { %s45_s8 = ssub.s32 %s1424_s25, %s1915_s29  ;;  %p193_p6 = scmp.eq.s32.totalorder %s1510_s27, 1 }
  0x15   : > { %p46_p7 = scmp.eq.s32.totalorder %s45_s8, 0  ;;  %p1530_p8 = por %p62_p5, %p61_p3 }
  0x16   : > { %p1534_p9 = por %p193_p6, %p55_p1  ;;  %p199_p10 = scmp.eq.s32.totalorder %s937_s28, 1 }
  0x17   : > { %s1892_s9 = scalar_select %p1530_p8, 1, 0 }
  0x18   : > { %s1893_s10 = scalar_select %p1534_p9, 1, 0 }
  0x19   : > { %s1539_s11 = scalar_select %p46_p7, %s1416_s23, %s48_s30  }
  0x1a   : > { %p1541_p11 = por %p199_p10, %p61_p3  ;;  %p1153_p13 = scmp.lt.s32.totalorder %s1428_s26, 2 }
  0x1b   : > { %1894 = sst [smem:[#allocation19_spill]] %s1539_s11  ;;  %s1548_s13 = sand.u32 1, %s1416_s23  }
  0x1c   : > { %s1895_s12 = scalar_select %p1541_p11, 1, 0 }
  0x1d   : > { %s268_s14 = sand.u32 1, %s1428_s26   ;;  %s943_s15 = sshll.u32 %s1548_s13, 1 }
  0x1e   : > { %p1554_p0 = pnand %p1153_p13, %p1522_p4  ;;  %s969_s17 = sshll.u32 %s1424_s25, 5 }
  0x1f   : > { %s1897_s1 = sld [smem:[#allocation21_spill]]  ;;  %s272_s28 = scalar_lea.vmem [#allocation6], %s943_s15 }
  0x20   : > { %s279_s30 = sshll.u32 %s272_s28, 4  ;;  %s1566_s7 = scalar_lea.sflag [#allocation7], %s268_s14  ;;  %s1564_s30 = int_to_ptr.vmem [resolvable:$true] %s279_s30 }
  0x21   : > { %p1572_p2 = pneg %p1554_p0 }
  0x25   : > { %s1562_s20 = scalar_lea.hbm %s1897_s1, %s969_s17  ;;  %s1225_s15 = scalar_lea.hbm %s1897_s1, 64 }
  0x26   : > { %s1220_s8 = scalar_lea.hbm %s1562_s20, 32  ;;  %p1226_p5 = scmp.lt.u32.totalorder %s1562_s20, %s1897_s1 }
  0x27   : > { %p1221_p1 = scmp.ne.s32.totalorder %s1562_s20, %s1220_s8  ;;  %p1227_p6 = scmp.lt.u32.totalorder %s1225_s15, %s1220_s8 }
  0x28   : > { %p1229_p10 = scmp.lt.u32.totalorder %s1220_s8, %s1562_s20 }
  0x29   : > { %p1223_p3 = pnand %p1572_p2, %p1221_p1  ;;  %p1228_p7 = por %p1227_p6, %p1226_p5 }
  0x2b   : > { %p1224_p4 = pneg %p1223_p3  ;;  %p1230_p13 = por %p1229_p10, %p1228_p7 }
  0x2d   : > { %p1231_p12 = pnand %p1230_p13, %p1224_p4 }
  0x2f   : > { %1234 = shalt.err (!%p1231_p12)
}
  0x30   : > { %s1235_s14 = scalar_lea.vmem %s1564_s30, 32  ;;  %s1430_s17 = smov [#allocation6]  }
  0x31   : > { %p1236_p1 = scmp.ne.s32.totalorder %s1564_s30, %s1235_s14  ;;  %s1240_s18 = sshll.u32 %s1430_s17, 4  ;;  %s1241_s18 = int_to_ptr.vmem [resolvable:$false] %s1240_s18 }
  0x32   : > { %s1242_s19 = scalar_lea.vmem %s1241_s18, 64  ;;  %p1243_p9 = scmp.lt.s32.totalorder %s1564_s30, %s1241_s18 }
  0x33   : > { %p1238_p3 = pnand %p1236_p1, %p1572_p2  ;;  %p1244_p8 = scmp.lt.s32.totalorder %s1242_s19, %s1235_s14 }
  0x35   : > { %p1239_p11 = pneg %p1238_p3  ;;  %p1245_p5 = por %p1244_p8, %p1243_p9 }
  0x37   : > { %p1246_p6 = pnand %p1245_p5, %p1239_p11 }
  0x39   : > { %1249 = shalt.err (!%p1246_p6)
}
  0x3a   : > { %s1431_s8 = smov 16   ;;  %s1432_s15 = smov 1  }
  0x3b   : > { %1142 = dma.hbm_to_vmem [thread:$0]  (!%p1554_p0), %s1562_s20, 32, %s1564_s30, %s1566_s7, %s1431_s8, %s1431_s8, %s1432_s15  }
  0x3c   : > { %p950_p12 = scmp.ge.s32.totalorder %s1428_s26, 1  ;;  %p329_p4 = scmp.lt.s32.totalorder %s1428_s26, 3 }
  0x3d   : > { %s940_s14 = sshll.u32 %s1548_s13, 4  ;;  %s968_s17 = sshll.u32 %s1424_s25, 8 }
  0x3e   : > { %p1598_p7 = pnand %p950_p12, %p329_p4  ;;  %s1900_s0 = sld [smem:[#allocation20_spill]] }
  0x3f   : > { %s251_s11 = scalar_lea.vmem [#allocation3], %s940_s14  ;;  %s248_s20 = scalar_lea.sflag [#allocation4], %s1548_s13 }
  0x40   : > { %s1899_s28 = scalar_select %p1598_p7, 1, 0 }
  0x41   : > { %s258_s23 = sshll.u32 %s251_s11, 4  ;;  %s1609_s23 = int_to_ptr.vmem [resolvable:$true] %s258_s23 }
  0x44   : > { %s1607_s1 = scalar_lea.hbm %s1900_s0, %s968_s17  ;;  %s1255_s18 = scalar_lea.hbm %s1900_s0, 512 }
  0x45   : > { %s1250_s30 = scalar_lea.hbm %s1607_s1, 256  ;;  %p1256_p10 = scmp.lt.u32.totalorder %s1607_s1, %s1900_s0 }
  0x46   : > { %p1251_p8 = scmp.ne.s32.totalorder %s1607_s1, %s1250_s30  ;;  %p1257_p13 = scmp.lt.u32.totalorder %s1255_s18, %s1250_s30 }
  0x47   : > { %p1259_p3 = scmp.lt.u32.totalorder %s1250_s30, %s1607_s1 }
  0x48   : > { %p1253_p9 = pnand %p1251_p8, %p1572_p2  ;;  %p1258_p1 = por %p1257_p13, %p1256_p10 }
  0x4a   : > { %p1254_p11 = pneg %p1253_p9  ;;  %p1260_p5 = por %p1259_p3, %p1258_p1 }
  0x4c   : > { %p1261_p6 = pnand %p1260_p5, %p1254_p11 }
  0x4e   : > { %1264 = shalt.err (!%p1261_p6)
}
  0x4f   : > { %s1265_s11 = scalar_lea.vmem %s1609_s23, 256  ;;  %s1433_s14 = smov [#allocation3]  }
  0x50   : > { %p1266_p12 = scmp.ne.s32.totalorder %s1609_s23, %s1265_s11  ;;  %s1270_s8 = sshll.u32 %s1433_s14, 4  ;;  %s1271_s8 = int_to_ptr.vmem [resolvable:$false] %s1270_s8 }
  0x51   : > { %s1272_s15 = scalar_lea.vmem %s1271_s8, 512  ;;  %p1273_p9 = scmp.lt.s32.totalorder %s1609_s23, %s1271_s8 }
  0x52   : > { %p1268_p4 = pnand %p1266_p12, %p1572_p2  ;;  %p1274_p7 = scmp.lt.s32.totalorder %s1272_s15, %s1265_s11 }
  0x54   : > { %p1269_p8 = pneg %p1268_p4  ;;  %p1275_p10 = por %p1274_p7, %p1273_p9 }
  0x56   : > { %p1276_p13 = pnand %p1275_p10, %p1269_p8 }
  0x58   : > { %1279 = shalt.err (!%p1276_p13)
}
  0x59   : > { %s1434_s30 = smov 128   ;;  %s1435_s18 = smov 8  }
  0x5a   : > { %1139 = dma.hbm_to_vmem [thread:$0]  (!%p1554_p0), %s1607_s1, 256, %s1609_s23, %s248_s20, %s1434_s30, %s1434_s30, %s1435_s18  }
  0x5b   : > { %s946_s17 = sshll.u32 %s1548_s13, 8  ;;  %s971_s19 = sshll.u32 %s1424_s25, 12 }
  0x5c   : > { %s1643_s8 = scalar_lea.hbm %s1876_s3, %s971_s19  ;;  %s301_s15 = scalar_lea.vmem [#allocation8], %s946_s17 }
  0x5d   : > { %s310_s0 = sshll.u32 %s301_s15, 4  ;;  %s1280_s26 = scalar_lea.hbm %s1643_s8, 4096  ;;  %s1645_s0 = int_to_ptr.vmem [resolvable:$true] %s310_s0 }
  0x5e   : > { %p1281_p7 = scmp.ne.s32.totalorder %s1643_s8, %s1280_s26  ;;  %s1285_s13 = scalar_lea.hbm %s1876_s3, 8192 }
  0x5f   : > { %p1286_p3 = scmp.lt.u32.totalorder %s1643_s8, %s1876_s3  ;;  %p1287_p5 = scmp.lt.u32.totalorder %s1285_s13, %s1280_s26 }
  0x60   : > { %p1283_p11 = pnand %p1281_p7, %p1572_p2  ;;  %p1289_p12 = scmp.lt.u32.totalorder %s1280_s26, %s1643_s8 }
  0x61   : > { %p1288_p6 = por %p1287_p5, %p1286_p3 }
  0x62   : > { %p1284_p1 = pneg %p1283_p11 }
  0x63   : > { %p1290_p4 = por %p1289_p12, %p1288_p6 }
  0x65   : > { %p1291_p8 = pnand %p1290_p4, %p1284_p1 }
  0x67   : > { %1294 = shalt.err (!%p1291_p8)
}
  0x68   : > { %s1295_s17 = scalar_lea.vmem %s1645_s0, 4096  ;;  %s1436_s11 = smov [#allocation8]  }
  0x69   : > { %p1296_p9 = scmp.ne.s32.totalorder %s1645_s0, %s1295_s17  ;;  %s1300_s14 = sshll.u32 %s1436_s11, 4  ;;  %s1301_s14 = int_to_ptr.vmem [resolvable:$false] %s1300_s14 }
  0x6a   : > { %s1302_s15 = scalar_lea.vmem %s1301_s14, 8192  ;;  %p1303_p7 = scmp.lt.s32.totalorder %s1645_s0, %s1301_s14 }
  0x6b   : > { %p1298_p10 = pnand %p1296_p9, %p1572_p2  ;;  %p1304_p11 = scmp.lt.s32.totalorder %s1302_s15, %s1295_s17 }
  0x6d   : > { %p1299_p13 = pneg %p1298_p10  ;;  %p1305_p3 = por %p1304_p11, %p1303_p7 }
  0x6f   : > { %p1306_p5 = pnand %p1305_p3, %p1299_p13 }
  0x71   : > { %1309 = shalt.err (!%p1306_p5)
}
  0x72   : > { %1145 = dma.hbm_to_vmem [thread:$0]  (!%p1554_p0), %s1643_s8, 4096, %s1645_s0, %s1566_s7, %s1434_s30, %s1434_s30, %s1435_s18  }
  0x73   : > { %p1901_p2 = scmp.ne.s32.totalorder %s1899_s28, 0 }
  0x74   : > { %s1675_s26 = sand.u32 (!%p1901_p2), 1, %s1412_s22   ;;  %p1902_p1 = scmp.ne.s32.totalorder (!%p1901_p2), %s1892_s9, 0 }
  0x75   : > { %333 = sbr.rel (%p1901_p2) target bundleno = 575 (0x23f), region = 40  ;;  %s1678_s29 = sshll.u32 (!%p1901_p2), %s1675_s26, 4 }
  0x76   : > { %s336_s16 = scalar_lea.sflag (!%p1901_p2), [#allocation4], %s1675_s26  ;;  %s339_s1 = scalar_lea.vmem (!%p1901_p2), [#allocation3], %s1678_s29 }
  0x7c   : > { %1391 = dma.done.wait (%p1902_p1), %s336_s16, 256  }
  0x7d   : > { %1393 = vsyncadd (%p1902_p1), %s336_s16, 4294967040  ;;  %s344_s0 = sand.u32 1, %s1510_s27   ;;  %s952_s7 = sshll.u32 %s1675_s26, 1 }
  0x7e   : > { %s345_s28 = scalar_lea.sflag [#allocation7], %s344_s0  ;;  %s1688_s30 = scalar_lea.vmem [#allocation6], %s952_s7 }
  0x7f   : > { %1395 = dma.done.wait (%p1902_p1), %s345_s28, 4128  }
  0x80   : > { %1397 = vsyncadd (%p1902_p1), %s345_s28, 4294963168  ;;  %v1437_v0 = vmov 0.0|0.0   ;;  %s953_s18 = sshll.u32 %s1675_s26, 8  ;;  %v1697_v1 = vld [vmem:[%s339_s1] sm:$0xff]  ;;  %v1700_v3 = vld [vmem:[%s339_s1 + $0x8] sm:$0xff]  ;;  %s956_s9 = sshll.u32 %s1420_s24, 1  ;;  %v485_v58 = vlaneseq }
  0x81   : > { %1078 = vmatprep.subr.bf16.mxu0 %v1437_v0  ;;  %1102 = vmatprep.subr.bf16.mxu1 %v1437_v0  ;;  %v440_v2 = vrot.slane %v1697_v1, 4  ;;  %v446_v4 = vrot.slane %v1700_v3, 4  ;;  %s1703_s27 = scalar_lea.vmem [#allocation8], %s953_s18  ;;  %p415_p0 = scmp.lt.s32.totalorder %s956_s9, 3  ;;  %v436_v60 = vld [vmem:[%s1688_s30] sm:$0x1] }
  0x82   : > { %v527_v5 = vld [vmem:[%s1703_s27] sm:$0xff]  ;;  %v528_v6 = vld [vmem:[%s1703_s27 + $0x8] sm:$0xff]  ;;  %v529_v7 = vld [vmem:[%s1703_s27 + $0x10] sm:$0xff]  ;;  %v486_v59 = vshrl.u32 %v485_v58, 7  ;;  %vm1438_vm0 = vmmov 0   ;;  %s404_s20 = scalar_lea.vmem [#allocation9], %s1678_s29 }
  0x83   : > { %v441_v8 = vadd.f32 %v440_v2, %v1697_v1  ;;  %v1079_v9 = vpack.c.bf16 %v528_v6, %v527_v5  ;;  %v530_v10 = vld [vmem:[%s1703_s27 + $0x18] sm:$0xff]  ;;  %v543_v11 = vld [vmem:[%s1703_s27 + $0x80] sm:$0xff]  ;;  %v544_v12 = vld [vmem:[%s1703_s27 + $0x88] sm:$0xff]  ;;  %v447_v13 = vadd.f32 %v446_v4, %v1700_v3  ;;  %s1917_s9 = smov (!%p415_p0, %s956_s9), 3  ;;  %s738_s19 = sshll.u32 %s404_s20, 4  ;;  %s1772_s19 = int_to_ptr.vmem [resolvable:$true] %s738_s19 }
  0x84   : > { %v1103_v14 = vpack.c.bf16 %v544_v12, %v543_v11  ;;  %v545_v15 = vld [vmem:[%s1703_s27 + $0x90] sm:$0xff]  ;;  %v1082_v17 = vpack.c.bf16 %v530_v10, %v529_v7  ;;  %v546_v18 = vld [vmem:[%s1703_s27 + $0x98] sm:$0xff]  ;;  %v531_v20 = vld [vmem:[%s1703_s27 + $0x20] sm:$0xff]  ;;  %s417_s13 = scalar_lea.vmem %s1875_s2, %s1917_s9  ;;  %v487_v61 = vsub.s32 0, %v486_v59  ;;  %s972_s17 = sshll.u32 %s1420_s24, 8 }
  0x85   : > { %v442_v16 = vrot.slane %v441_v8, 2  ;;  %1080 = vmatpush3.bf16.msra.mxu0 %v1079_v9  ;;  %v448_v19 = vrot.slane %v447_v13, 2  ;;  %v532_v21 = vld [vmem:[%s1703_s27 + $0x28] sm:$0xff]  ;;  %v1106_v22 = vpack.c.bf16 %v546_v18, %v545_v15  ;;  %v547_v24 = vld [vmem:[%s1703_s27 + $0xa0] sm:$0xff]  ;;  %v533_v30 = vld [vmem:[%s1703_s27 + $0x30] sm:$0xff]  ;;  %s1780_s15 = scalar_lea.hbm %s1878_s5, %s972_s17  ;;  %s720_s16 = scalar_lea.sflag [#allocation5], %s1675_s26 }
  0x86   : > { %1081 = vmatprep.subr.bf16.mxu0 %v1437_v0  ;;  %1104 = vmatpush3.bf16.msra.mxu1 %v1103_v14  ;;  %v548_v25 = vld [vmem:[%s1703_s27 + $0xa8] sm:$0xff]  ;;  %v1085_v28 = vpack.c.bf16 %v532_v21, %v531_v20  ;;  %v534_v31 = vld [vmem:[%s1703_s27 + $0x38] sm:$0xff]  ;;  %s1310_s1 = scalar_lea.vmem %s1772_s19, 256  ;;  %p1903_p12 = scmp.ne.s32.totalorder %s1893_s10, 0 }
  0x87   : > { %v443_v23 = vadd.f32 %v442_v16, %v441_v8  ;;  %1105 = vmatprep.subr.bf16.mxu1 %v1437_v0  ;;  %v449_v26 = vadd.f32 %v448_v19, %v447_v13  ;;  %v1109_v32 = vpack.c.bf16 %v548_v25, %v547_v24  ;;  %v1088_v36 = vpack.c.bf16 %v534_v31, %v533_v30  ;;  %v437_v62 = vld [vmem:[%s1688_s30 + $0x1] sm:$0x1]  ;;  %v438_v5 = vld [vmem:[%s417_s13] sm:$0x1]  ;;  %v552_v30 = vld [vmem:[%s1703_s27 + $0xc8] sm:$0xff]  ;;  %p1311_p6 = scmp.ne.s32.totalorder %s1772_s19, %s1310_s1  ;;  %s1440_s0 = smov [#allocation9]  }
  0x88   : > { %v439_v9 = vld [vmem:[%s417_s13 + $0x1] sm:$0x1]  ;;  %s1314_s7 = sshll.u32 %s1440_s0, 4  ;;  %s1315_s7 = int_to_ptr.vmem [resolvable:$false] %s1314_s7 }
  0x89   : > { %v444_v27 = vrot.slane %v443_v23, 1  ;;  %1083 = vmatpush3.bf16.msra.mxu0 %v1082_v17  ;;  %v450_v29 = vrot.slane %v449_v26, 1  ;;  %p1312_p4 = pnand %p1311_p6, %p1903_p12  ;;  %s1316_s28 = scalar_lea.vmem %s1315_s7, 512 }
  0x8a   : > { %1084 = vmatprep.subr.bf16.mxu0 %v1437_v0  ;;  %1107 = vmatpush3.bf16.msra.mxu1 %v1106_v22  ;;  %v535_v22 = vld [vmem:[%s1703_s27 + $0x40] sm:$0xff]  ;;  %p1317_p9 = scmp.lt.s32.totalorder %s1772_s19, %s1315_s7  ;;  %p1318_p10 = scmp.lt.s32.totalorder %s1316_s28, %s1310_s1 }
  0x8b   : > { %v445_v33 = vadd.f32 %v444_v27, %v443_v23  ;;  %1108 = vmatprep.subr.bf16.mxu1 %v1437_v0  ;;  %v451_v34 = vadd.f32 %v450_v29, %v449_v26  ;;  %v549_v23 = vld [vmem:[%s1703_s27 + $0xb0] sm:$0xff]  ;;  %v538_v27 = vld [vmem:[%s1703_s27 + $0x58] sm:$0xff]  ;;  %p1313_p8 = pneg %p1312_p4 }
  0x8c   : > { %v537_v26 = vld [vmem:[%s1703_s27 + $0x50] sm:$0xff]  ;;  %p1319_p13 = por %p1318_p10, %p1317_p9 }
  0x8d   : > { %v453_v35 = vmul.f32 0.125, %v445_v33  ;;  %1086 = vmatpush3.bf16.msra.mxu0 %v1085_v28  ;;  %v454_v37 = vmul.f32 0.125, %v451_v34  ;;  %v551_v28 = vld [vmem:[%s1703_s27 + $0xc0] sm:$0xff]  ;;  %v1094_v29 = vpack.c.bf16 %v538_v27, %v537_v26  ;;  %v540_v33 = vld [vmem:[%s1703_s27 + $0x68] sm:$0xff]  ;;  %v553_v34 = vld [vmem:[%s1703_s27 + $0xd0] sm:$0xff] }
  0x8e   : > { %1087 = vmatprep.subr.bf16.mxu0 %v1437_v0  ;;  %1110 = vmatpush3.bf16.msra.mxu1 %v1109_v32  ;;  %v1115_v31 = vpack.c.bf16 %v552_v30, %v551_v28  ;;  %v539_v32 = vld [vmem:[%s1703_s27 + $0x60] sm:$0xff]  ;;  %p1320_p7 = pnand %p1319_p13, %p1313_p8 }
  0x8f   : > { %v455_v38 = vsub.f32 %v1697_v1, %v453_v35  ;;  %1111 = vmatprep.subr.bf16.mxu1 %v1437_v0  ;;  %v456_v39 = vsub.f32 %v1700_v3, %v454_v37 }
  0x91   : > { %v457_v40 = vmul.f32 %v455_v38, %v455_v38  ;;  %1089 = vmatpush3.bf16.msra.mxu0 %v1088_v36  ;;  %v458_v41 = vmul.f32 %v456_v39, %v456_v39  ;;  %v554_v36 = vld [vmem:[%s1703_s27 + $0xd8] sm:$0xff] }
  0x92   : > { %1090 = vmatprep.subr.bf16.mxu0 %v1437_v0  ;;  %v542_v38 = vld [vmem:[%s1703_s27 + $0x78] sm:$0xff]  ;;  %v1118_v39 = vpack.c.bf16 %v554_v36, %v553_v34 }
  0x93   : > { %v459_v42 = vrot.slane %v457_v40, 4  ;;  %v465_v43 = vrot.slane %v458_v41, 4 }
  0x95   : > { %v460_v44 = vadd.f32 %v459_v42, %v457_v40  ;;  %v466_v45 = vadd.f32 %v465_v43, %v458_v41  ;;  %v555_v40 = vld [vmem:[%s1703_s27 + $0xe0] sm:$0xff]  ;;  %v556_v41 = vld [vmem:[%s1703_s27 + $0xe8] sm:$0xff]  ;;  %v1439_v42 = vmov 0.0  }
  0x96   : > { %1040 = vmatprep.mubr.msk.f32.mxu0 %vm1438_vm0, %v1439_v42  ;;  %1075 = vmatprep.mubr.msk.f32.mxu1 %vm1438_vm0, %v1439_v42 }
  0x97   : > { %v461_v46 = vrot.slane %v460_v44, 2  ;;  %v467_v47 = vrot.slane %v466_v45, 2 }
  0x99   : > { %v462_v48 = vadd.f32 %v461_v46, %v460_v44  ;;  %v468_v49 = vadd.f32 %v467_v47, %v466_v45  ;;  %v1121_v44 = vpack.c.bf16 %v556_v41, %v555_v40  ;;  %v557_v45 = vld [vmem:[%s1703_s27 + $0xf0] sm:$0xff]  ;;  %v558_v46 = vld [vmem:[%s1703_s27 + $0xf8] sm:$0xff] }
  0x9a   : > { %v1124_v47 = vpack.c.bf16 %v558_v46, %v557_v45 }
  0x9b   : > { %v463_v50 = vrot.slane %v462_v48, 1  ;;  %v469_v51 = vrot.slane %v468_v49, 1 }
  0x9d   : > { %v464_v52 = vadd.f32 %v463_v50, %v462_v48  ;;  %v470_v53 = vadd.f32 %v469_v51, %v468_v49 }
  0x9f   : > { %v471_v54 = vmul.f32 0.125, %v464_v52  ;;  %v472_v55 = vmul.f32 0.125, %v470_v53 }
  0xa1   : > { %v473_v56 = vadd.f32 1e-05, %v471_v54  ;;  %v474_v57 = vadd.f32 1e-05, %v472_v55 }
  0xa3   : > { %1212 = vrsqrt.f32 %v473_v56 }
  0xa4   : > { %1214 = vrsqrt.f32 %v474_v57 }
  0xad   : > { %v1213_v63 = vpop.eup %1212 }
  0xae   : > { %v1215_v2 = vpop.eup %1214  ;;  %v477_v4 = vmul.f32 %v1213_v63, %v436_v60 }
  0xaf   : > { %v478_v6 = vmul.f32 %v1215_v2, %v437_v62 }
  0xb0   : > { %v479_v7 = vmul.f32 %v477_v4, %v453_v35  ;;  %v488_v8 = vrot.slane %v477_v4, %v487_v61  ;;  %v1097_v35 = vpack.c.bf16 %v540_v33, %v539_v32 }
  0xb1   : > { %v480_v10 = vmul.f32 %v478_v6, %v454_v37  ;;  %v492_v11 = vrot.slane %v478_v6, %v487_v61  ;;  %v541_v37 = vld [vmem:[%s1703_s27 + $0x70] sm:$0xff] }
  0xb2   : > { %v481_v12 = vsub.f32 %v438_v5, %v479_v7  ;;  %v495_v13 = vmul.f32 %v488_v8, %v1697_v1  ;;  %v536_v1 = vld [vmem:[%s1703_s27 + $0x48] sm:$0xff]  ;;  %v1100_v43 = vpack.c.bf16 %v542_v38, %v541_v37 }
  0xb3   : > { %v482_v14 = vsub.f32 %v439_v9, %v480_v10  ;;  %v496_v15 = vmul.f32 %v492_v11, %v1700_v3  ;;  %v1091_v24 = vpack.c.bf16 %v536_v1, %v535_v22  ;;  %v550_v3 = vld [vmem:[%s1703_s27 + $0xb8] sm:$0xff] }
  0xb4   : > { %v502_v16 = vrot.slane %v481_v12, %v487_v61  ;;  %v1112_v25 = vpack.c.bf16 %v550_v3, %v549_v23 }
  0xb5   : > { %v506_v17 = vrot.slane %v482_v14, %v487_v61  ;;  %1092 = vmatpush3.bf16.msra.mxu0 %v1091_v24 }
  0xb6   : > { %v509_v18 = vadd.f32 %v502_v16, %v495_v13  ;;  %1113 = vmatpush3.bf16.msra.mxu1 %v1112_v25  ;;  %1093 = vmatprep.subr.bf16.mxu0 %v1437_v0 }
  0xb7   : > { %v1741_v19 = vadd.f32 %v506_v17, %v496_v15  ;;  %1114 = vmatprep.subr.bf16.mxu1 %v1437_v0 }
  0xb8   : > { %v511_v20 = vmul.f32 %v509_v18, %v509_v18 }
  0xb9   : > { %v512_v21 = vmul.f32 %v1741_v19, %v1741_v19  ;;  %1095 = vmatpush3.bf16.msra.mxu0 %v1094_v29 }
  0xba   : > { %513 = vadd.xlane.f32.xlu0 %v511_v20  ;;  %1116 = vmatpush3.bf16.msra.mxu1 %v1115_v31 }
  0xbb   : > { %1096 = vmatprep.subr.bf16.mxu0 %v1437_v0  ;;  %1117 = vmatprep.subr.bf16.mxu1 %v1437_v0 }
  0xbd   : > { %1098 = vmatpush3.bf16.msra.mxu0 %v1097_v35 }
  0xbe   : > { %515 = vadd.xlane.f32.xlu0 %v512_v21  ;;  %1119 = vmatpush3.bf16.msra.mxu1 %v1118_v39 }
  0xbf   : > { %1099 = vmatprep.subr.bf16.mxu0 %v1437_v0  ;;  %1120 = vmatprep.subr.bf16.mxu1 %v1437_v0 }
  0xc1   : > { %1101 = vmatpush3.bf16.msra.mxu0 %v1100_v43 }
  0xc2   : > { %1122 = vmatpush3.bf16.msra.mxu1 %v1121_v44 }
  0xc3   : > { %1123 = vmatprep.subr.bf16.mxu1 %v1437_v0 }
  0xc6   : > { %1125 = vmatpush3.bf16.msra.mxu1 %v1124_v47 }
 0x147   : > { %v514_v48 = vpop.xlane.xlu0 %513 }
 0x148   : > { %v517_v49 = vmax.f32 %v514_v48, 1e-24 }
 0x14a   : > { %1216 = vrsqrt.f32 %v517_v49 }
 0x14b   : > { %v516_v50 = vpop.xlane.xlu0 %515 }
 0x14c   : > { %v518_v51 = vmax.f32 %v516_v50, 1e-24 }
 0x14e   : > { %1218 = vrsqrt.f32 %v518_v51 }
 0x154   : > { %v1217_v52 = vpop.eup %1216 }
 0x155   : > { %v521_v53 = vmul.f32 %v1217_v52, %v509_v18 }
 0x157   : > { %525 = vst [vmem:[%s404_s20] sm:$0xff] %v521_v53  ;;  %1041 = vmatmul.mubr.f32.vlgmr.msra.gmra.mrb[0].mxu0 %v521_v53 }
 0x158   : > { %v1219_v54 = vpop.eup %1218 }
 0x159   : > { %v522_v0 = vmul.f32 %v1219_v54, %v1741_v19 }
 0x15b   : > { %526 = vst [vmem:[%s404_s20 + $0x8] sm:$0xff] %v522_v0  ;;  %1076 = vmatmul.mubr.f32.vlgmr.msra.gmra.mrb[0].mxu1 %v522_v0 }
 0x15c   : > { %1323 = shalt.err (!%p1320_p7)
}
 0x15d   : > { %s1324_s30 = scalar_lea.hbm %s1780_s15, 256  ;;  %s1328_s8 = scalar_lea.hbm %s1878_s5, 512 }
 0x15e   : > { %p1325_p11 = scmp.ne.s32.totalorder %s1780_s15, %s1324_s30  ;;  %p1329_p2 = scmp.lt.u32.totalorder %s1780_s15, %s1878_s5 }
 0x15f   : > { %p1330_p1 = scmp.lt.u32.totalorder %s1328_s8, %s1324_s30  ;;  %p1332_p6 = scmp.lt.u32.totalorder %s1324_s30, %s1780_s15 }
 0x160   : > { %p1326_p3 = pnand %p1325_p11, %p1903_p12 }
 0x161   : > { %p1331_p0 = por %p1330_p1, %p1329_p2 }
 0x162   : > { %p1327_p5 = pneg %p1326_p3 }
 0x163   : > { %p1333_p4 = por %p1332_p6, %p1331_p0 }
 0x165   : > { %p1334_p8 = pnand %p1333_p4, %p1327_p5 }
 0x167   : > { %1337 = shalt.err (!%p1334_p8)
}
 0x168   : > { %s1441_s20 = smov 128   ;;  %s1442_s11 = smov 8  }
 0x169   : > { %1132 = dma.vmem_to_hbm [thread:$0]  (%p1903_p12), %s1772_s19, 256, %s1780_s15, %s720_s16, %s1441_s20, %s1441_s20, %s1442_s11  }
 0x16a   : > { %s426_s0 = scalar_lea.vmem %s1877_s4, %s1917_s9  ;;  %s411_s7 = scalar_lea.vmem [#allocation10], %s1678_s29 }
 0x16b   : > { %v958_v55 = vld [vmem:[%s426_s0] ss:$0 sm:$0xff]  ;;  %s755_s28 = sshll.u32 %s411_s7, 4  ;;  %v959_v59 = vld [vmem:[%s426_s0 + $0x1] ss:$0 sm:$0xff]  ;;  %s1821_s15 = scalar_lea.hbm %s1879_s6, %s972_s17  ;;  %s1814_s28 = int_to_ptr.vmem [resolvable:$true] %s755_s28 }
 0x16c   : > { %s725_s29 = scalar_lea.sflag [#allocation11], %s1675_s26  ;;  %s1338_s16 = scalar_lea.vmem %s1814_s28, 256 }
 0x16d   : > { %p1339_p9 = scmp.ne.s32.totalorder %s1814_s28, %s1338_s16  ;;  %s1443_s30 = smov [#allocation10]  }
 0x16e   : > { %s1342_s18 = sshll.u32 %s1443_s30, 4  ;;  %s1343_s18 = int_to_ptr.vmem [resolvable:$false] %s1342_s18 }
 0x16f   : > { %p1340_p10 = pnand %p1339_p9, %p1903_p12  ;;  %s1344_s27 = scalar_lea.vmem %s1343_s18, 512 }
 0x170   : > { %p1345_p7 = scmp.lt.s32.totalorder %s1814_s28, %s1343_s18  ;;  %p1346_p11 = scmp.lt.s32.totalorder %s1344_s27, %s1338_s16 }
 0x171   : > { %p1341_p13 = pneg %p1340_p10 }
 0x172   : > { %p1347_p3 = por %p1346_p11, %p1345_p7 }
 0x174   : > { %p1348_p5 = pnand %p1347_p3, %p1341_p13 }
 0x22a   : > { %v627_v56 = vpop.f32.mrb[0].mxu0 }
 0x22b   : > { %v715_v57 = vmul.f32 %v958_v55, %v627_v56  ;;  %v1042_v58 = vpop.f32.mrb[1].mxu0 }
 0x22d   : > { %717 = vst [vmem:[%s411_s7] sm:$0xff] %v715_v57 }
 0x22e   : > { %v697_v60 = vpop.f32.mrb[0].mxu1 }
 0x22f   : > { %v716_v61 = vmul.f32 %v959_v59, %v697_v60  ;;  %v1077_v62 = vpop.f32.mrb[1].mxu1 }
 0x231   : > { %718 = vst [vmem:[%s411_s7 + $0x8] sm:$0xff] %v716_v61 }
 0x232   : > { %1351 = shalt.err (!%p1348_p5)
}
 0x233   : > { %s1352_s24 = scalar_lea.hbm %s1821_s15, 256  ;;  %s1356_s23 = scalar_lea.hbm %s1879_s6, 512 }
 0x234   : > { %p1353_p2 = scmp.ne.s32.totalorder %s1821_s15, %s1352_s24  ;;  %p1357_p6 = scmp.lt.u32.totalorder %s1821_s15, %s1879_s6 }
 0x235   : > { %p1358_p4 = scmp.lt.u32.totalorder %s1356_s23, %s1352_s24  ;;  %p1360_p9 = scmp.lt.u32.totalorder %s1352_s24, %s1821_s15 }
 0x236   : > { %p1354_p1 = pnand %p1353_p2, %p1903_p12 }
 0x237   : > { %p1359_p8 = por %p1358_p4, %p1357_p6 }
 0x238   : > { %p1355_p0 = pneg %p1354_p1 }
 0x239   : > { %p1361_p10 = por %p1360_p9, %p1359_p8 }
 0x23b   : > { %p1362_p13 = pnand %p1361_p10, %p1355_p0 }
 0x23d   : > { %1365 = shalt.err (!%p1362_p13)
}
 0x23e   : > { %1133 = dma.vmem_to_hbm [thread:$0]  (%p1903_p12), %s1814_s28, 256, %s1821_s15, %s725_s29, %s1441_s20, %s1441_s20, %s1442_s11  }
 0x23f PF: > { %s1904_s1 = sld [smem:[#allocation17_spill]]  ;;  %s770_s0 = sand.u32 1, %s1408_s21  }
 0x240   : > { %p1905_p7 = scmp.ne.s32.totalorder %s1895_s12, 0  ;;  %s771_s7 = scalar_lea.sflag [#allocation5], %s770_s0 }
 0x245   : > { %p1906_p11 = scmp.ge.s32.totalorder %s1904_s1, 2 }
 0x247   : > { %p1147_p3 = pnand %p1906_p11, %p1905_p7 }
 0x249   : > { %1399 = dma.done.wait (!%p1147_p3), %s771_s7, 256  }
 0x24a   : > { %1401 = vsyncadd (!%p1147_p3), %s771_s7, 4294967040  ;;  %s780_s10 = scalar_lea.sflag [#allocation11], %s770_s0 }
 0x24b   : > { %1403 = dma.done.wait (!%p1147_p3), %s780_s10, 256  }
 0x24c   : > { %1405 = vsyncadd (!%p1147_p3), %s780_s10, 4294967040  ;;  %s29_s26 = sadd.s32 1, %s1904_s1   ;;  %s1907_s19 = sld [smem:[#allocation16_spill]] }
 0x24d   : > { %p26_p5 = scmp.ge.s32.totalorder %s29_s26, 4   ;;  %s1908_s23 = sld [smem:[#allocation19_spill]] }
 0x24e   : > { %s1909_s20 = sld [smem:[#allocation18_spill]]  ;;  %s1910_s21 = smov %s1412_s22 }
 0x24f   : > { %s1912_s24 = smov %s1424_s25  ;;  %28 = sbr.rel (!%p26_p5) target bundleno = 13 (0xd), region = 136 }
 0x252   : > { %s1911_s22 = smov %s1907_s19 }
 0x254   : > { %s1913_s25 = smov %s1909_s20 }
 0x256   :  { %785 = vsyncpa [#allocation4], 1 }
 0x257   :  { %787 = vsyncpa [#allocation4 + $0x1], 1 }
 0x258   :  { %788 = vsyncpa [#allocation7], 1 }
 0x259   :  { %790 = vsyncpa [#allocation7 + $0x1], 1 }
 0x25a   :  { %791 = vsyncpa [#allocation5], 1 }
 0x25b   :  { %793 = vsyncpa [#allocation5 + $0x1], 1 }
 0x25c   :  { %794 = vsyncpa [#allocation11], 1 }
 0x25d   :  { %796 = vsyncpa [#allocation11 + $0x1], 1 }

</bundles_post_ra>
